<compile_context>
chip_gen: v7x
topology: tpu7x:2x2x1
jax: 0.10.0
libtpu: 0.0.40
codegen_flags: <defaults>
</compile_context>

<pallas_src>
import functools

import jax
import jax.numpy as jnp
import numpy as np
from jax.experimental import pallas as pl
from jax.experimental.pallas import tpu as pltpu


def _round_up(x, m):
    return (x + m - 1) // m * m


def _logits_kernel(x_ref, p_ref, *out_refs, tile_n, tiles_per_split, num_tiles,
                   n_valid, emit_patch_logits):
    """One (core-split, batch, patch-tile) step of the patch/prototype logits.

    x_ref:      (1, TN, D)       raw patch tokens for this tile (native dtype)
    p_ref:      (CK_pad, D)      L2-normalized, zero-padded prototypes
    out_refs:   [logits_ref (1, TN, CK_pad)] if emit_patch_logits, then
                img_ref (1, 1, 1, CK_pad)   per-split running max over patches
    """
    if emit_patch_logits:
        logits_ref, img_ref = out_refs
    else:
        (img_ref,) = out_refs

    s = pl.program_id(0)
    nt = pl.program_id(2)
    g_tile = s * tiles_per_split + nt          # global patch-tile index

    x = x_ref[0]                               # (TN, D) native dtype
    xf = x.astype(jnp.float32)
    sumsq = jnp.sum(xf * xf, axis=-1, keepdims=True)
    # F.normalize(p=2, eps=1e-12) semantics; rsqrt runs on the EUP slot.
    inv_norm = jax.lax.rsqrt(jnp.maximum(sumsq, 1e-24))          # (TN, 1)

    # 'n d, m d -> n m' on the MXU, f32 accumulate; normalize AFTER the matmul.
    raw = jax.lax.dot_general(
        x.astype(p_ref.dtype), p_ref[...],
        (((1,), (1,)), ((), ())),
        preferred_element_type=jnp.float32)                      # (TN, CK_pad)
    logits = raw * inv_norm                                      # f32

    if emit_patch_logits:
        logits_ref[0] = logits.astype(logits_ref.dtype)

    def _accumulate(tile_max):                                   # (1, CK_pad)
        tmax = tile_max[None, None]                              # (1,1,1,CK_pad)

        @pl.when(nt == 0)
        def _():
            img_ref[...] = tmax

        @pl.when(nt > 0)
        def _():
            img_ref[...] = jnp.maximum(img_ref[...], tmax)

    rows_in_last = n_valid - (num_tiles - 1) * tile_n            # static int
    if rows_in_last == tile_n:
        # N divides evenly: no ragged tile, no masking anywhere.
        _accumulate(jnp.max(logits, axis=0, keepdims=True))
    else:
        # Only the single boundary tile pays for the iota/compare/select.
        @pl.when(g_tile != num_tiles - 1)
        def _():
            _accumulate(jnp.max(logits, axis=0, keepdims=True))

        @pl.when(g_tile == num_tiles - 1)
        def _():
            row = jax.lax.broadcasted_iota(jnp.int32, (tile_n, 1), 0)
            masked = jnp.where(row < rows_in_last, logits, -jnp.inf)
            _accumulate(jnp.max(masked, axis=0, keepdims=True))


def wsi_pnp_forward(patch_tokens, prototypes, sa_weights, *,
                    temperature=0.2,
                    patch_tile=512,
                    max_patch_tile=1024,
                    matmul_dtype=jnp.bfloat16,
                    patch_logits_dtype=jnp.float32,
                    return_patch_logits=True,
                    num_core_splits=2,
                    vmem_limit_bytes=40 * 1024 * 1024):
    """Inference forward of WSI_PNP (labels=None path)."""
    B, N, D = patch_tokens.shape
    C, K, _ = prototypes.shape
    n_classes = C - 1
    CK = C * K
    CK_pad = _round_up(CK, 128)   # lane-dense outputs; do NOT pad to 256 (HBM-bound)

    # --- prototype normalization hoisted out of the grid loop (done once) ---
    proto = prototypes.reshape(CK, D).astype(jnp.float32)
    psq = jnp.sum(proto * proto, axis=-1, keepdims=True)
    proto = proto * jax.lax.rsqrt(jnp.maximum(psq, 1e-24))
    proto = jnp.pad(proto, ((0, CK_pad - CK), (0, 0))).astype(matmul_dtype)

    # --- patch tile: multiple of 16 rows (bf16 packing), fits the VMEM budget ---
    x_bytes = patch_tokens.dtype.itemsize
    pl_bytes = np.dtype(patch_logits_dtype).itemsize if return_patch_logits else 0
    p_bytes = np.dtype(matmul_dtype).itemsize

    def footprint(t):
        b = 2 * t * D * x_bytes           # input tile, double-buffered
        b += 2 * t * CK_pad * pl_bytes    # patch-logits tile, double-buffered
        b += 2 * CK_pad * D * p_bytes     # resident prototype block (2 copies)
        b += 2 * CK_pad * 4               # image-logit accumulator block
        b += t * D * 4                    # f32 upcast temp for sum-of-squares
        b += 2 * t * CK_pad * 4           # f32 matmul result + scaled copy
        return b

    tn = min(_round_up(N, 16),
             _round_up(max(min(patch_tile, max_patch_tile), 16), 16))
    while tn > 16 and footprint(tn) > (vmem_limit_bytes * 3) // 4:
        tn = max(16, _round_up(tn // 2, 16))

    num_tiles = pl.cdiv(N, tn)            # ragged last tile handled in-kernel
    n_splits = num_core_splits if (num_core_splits > 1 and
                                   num_tiles % num_core_splits == 0) else 1
    tiles_per_split = num_tiles // n_splits

    kernel = functools.partial(
        _logits_kernel, tile_n=tn, tiles_per_split=tiles_per_split,
        num_tiles=num_tiles, n_valid=N, emit_patch_logits=return_patch_logits)

    img_shape = jax.ShapeDtypeStruct((n_splits, B, 1, CK_pad), jnp.float32)
    img_spec = pl.BlockSpec((1, 1, 1, CK_pad), lambda s, b, n: (s, b, 0, 0))
    if return_patch_logits:
        out_shape = (jax.ShapeDtypeStruct((B, N, CK_pad), patch_logits_dtype),
                     img_shape)
        out_specs = (
            pl.BlockSpec((1, tn, CK_pad),
                         lambda s, b, n: (b, s * tiles_per_split + n, 0)),
            img_spec)
    else:
        out_shape = img_shape
        out_specs = img_spec

    outs = pl.pallas_call(
        kernel,
        out_shape=out_shape,
        grid=(n_splits, B, tiles_per_split),
        in_specs=[
            pl.BlockSpec((1, tn, D),
                         lambda s, b, n: (b, s * tiles_per_split + n, 0)),
            pl.BlockSpec((CK_pad, D), lambda s, b, n: (0, 0)),   # resident protos
        ],
        out_specs=out_specs,
        compiler_params=pltpu.CompilerParams(
            dimension_semantics=("parallel", "parallel", "arbitrary"),
            vmem_limit_bytes=vmem_limit_bytes),
    )(patch_tokens, proto)

    if return_patch_logits:
        logits_pad, img_pad = outs
        # Only the cheap CK_pad->CK column slice remains (N axis is exact).
        patch_prototype_logits = logits_pad[:, :, :CK].reshape(B, N, C, K)
    else:
        img_pad = outs
        patch_prototype_logits = None

    image_prototype_logits = jnp.max(img_pad, axis=0)[:, 0, :CK].reshape(B, C, K)

    # ScoreAggregation classifier: B x n_classes x K elements -> plain JAX.
    saw = jax.nn.softmax(sa_weights.astype(jnp.float32), axis=-1) * K
    class_logits = jnp.sum(
        image_prototype_logits[:, :n_classes, :] * saw[None, :, :],
        axis=-1) / temperature

    return dict(
        patch_prototype_logits=patch_prototype_logits,
        image_prototype_logits=image_prototype_logits,
        class_logits=class_logits,
    )


def _reference(patch_tokens, prototypes, sa_weights, temperature):
    xn = patch_tokens / jnp.maximum(
        jnp.linalg.norm(patch_tokens, axis=-1, keepdims=True), 1e-12)
    pn = prototypes / jnp.maximum(
        jnp.linalg.norm(prototypes, axis=-1, keepdims=True), 1e-12)
    ppl = jnp.einsum('bnd,ckd->bnck', xn, pn)
    ipl = ppl.max(axis=1)
    K = prototypes.shape[1]
    saw = jax.nn.softmax(sa_weights, axis=-1) * K
    cls = (ipl[:, :-1, :] * saw).sum(-1) / temperature
    return ppl, ipl, cls


if __name__ == "__main__":
    B, dim = 2, 32
    n_classes, n_prototypes = 10, 5
    C = n_classes + 1
    temperature = 0.2
    sa_init = 0.5

    key = jax.random.PRNGKey(0)
    k_x1, k_x2, k_p = jax.random.split(key, 3)

    # Deterministic parameter init mirroring __init__:
    # prototypes: trunc_normal_(std=0.02); ScoreAggregation weights: full(sa_init)
    prototypes = (0.02 * jax.random.truncated_normal(
        k_p, -2.0, 2.0, (C, n_prototypes, dim))).astype(jnp.float32)
    sa_weights = jnp.full((n_classes, n_prototypes), sa_init, dtype=jnp.float32)

    # --- Test 1: exact-semantics path (f32 MXU operands), ragged last tile,
    #     odd tile count so the core split falls back to 1.  H = W = 6.
    N1 = 36
    x1 = jax.random.normal(k_x1, (B, N1, dim), dtype=jnp.float32)
    ref_ppl, ref_ipl, ref_cls = _reference(x1, prototypes, sa_weights, temperature)
    out32 = wsi_pnp_forward(x1, prototypes, sa_weights, temperature=temperature,
                            patch_tile=16, matmul_dtype=jnp.float32)
    jax.block_until_ready(out32)
    np.testing.assert_allclose(np.asarray(out32["patch_prototype_logits"]),
                               np.asarray(ref_ppl), atol=1e-5, rtol=1e-5)
    np.testing.assert_allclose(np.asarray(out32["image_prototype_logits"]),
                               np.asarray(ref_ipl), atol=1e-5, rtol=1e-5)
    np.testing.assert_allclose(np.asarray(out32["class_logits"]),
                               np.asarray(ref_cls), atol=1e-5, rtol=1e-5)

    # --- Test 2: production fast path: bf16 tokens DMA'd natively, bf16 MXU
    #     operands (f32 accumulate), 2-way core split (4 tiles) AND a ragged
    #     boundary tile (60 = 3*16 + 12).
    N2 = 60
    x2 = jax.random.normal(k_x2, (B, N2, dim),
                           dtype=jnp.float32).astype(jnp.bfloat16)
    ref2_ppl, ref2_ipl, ref2_cls = _reference(
        x2.astype(jnp.float32), prototypes, sa_weights, temperature)
    out16 = wsi_pnp_forward(x2, prototypes, sa_weights, temperature=temperature,
                            patch_tile=16)
    jax.block_until_ready(out16)
    np.testing.assert_allclose(np.asarray(out16["patch_prototype_logits"]),
                               np.asarray(ref2_ppl), atol=5e-2, rtol=5e-2)
    np.testing.assert_allclose(np.asarray(out16["image_prototype_logits"]),
                               np.asarray(ref2_ipl), atol=5e-2, rtol=5e-2)
    np.testing.assert_allclose(np.asarray(out16["class_logits"]),
                               np.asarray(ref2_cls), atol=5e-2, rtol=5e-2)

    # --- Test 3: image-level-only path (skip the big patch-logits output).
    out_img = wsi_pnp_forward(x2, prototypes, sa_weights, temperature=temperature,
                              patch_tile=16, return_patch_logits=False)
    jax.block_until_ready(out_img)
    assert out_img["patch_prototype_logits"] is None
    np.testing.assert_allclose(np.asarray(out_img["image_prototype_logits"]),
                               np.asarray(out16["image_prototype_logits"]),
                               atol=1e-6, rtol=1e-6)
    np.testing.assert_allclose(np.asarray(out_img["class_logits"]),
                               np.asarray(out16["class_logits"]),
                               atol=1e-6, rtol=1e-6)

    print("KERNEL_OK")
</pallas_src>

<mosaic_0001>
module attributes {stable_mosaic.version = 11 : i64} {
  func.func @_logits_kernel(%arg0: i32, %arg1: i32, %arg2: i32, %arg3: memref<1x16x32xf32, #tpu.memory_space<vmem>>, %arg4: memref<128x32xf32, #tpu.memory_space<vmem>>, %arg5: memref<1x16x128xf32, #tpu.memory_space<vmem>>, %arg6: memref<1x1x1x128xf32, #tpu.memory_space<vmem>>) attributes {dimension_semantics = [#tpu.dimension_semantics<parallel>, #tpu.dimension_semantics<parallel>, #tpu.dimension_semantics<arbitrary>], iteration_bounds = array<i64: 1, 2, 3>, scalar_prefetch = 0 : i64, scratch_operands = 0 : i64, tpu.core_type = #tpu.core_type<tc>, window_params = [{transform_indices = @transform_0, window_bounds = array<i64: 1, 16, 32>}, {pipeline_mode = #tpu.pipeline_mode<synchronous>, transform_indices = @transform_1, window_bounds = array<i64: 128, 32>}, {transform_indices = @transform_2, window_bounds = array<i64: 1, 16, 128>}, {transform_indices = @transform_3, window_bounds = array<i64: 1, 1, 1, 128>}]} {
    %c3_i32 = arith.constant 3 : i32
    %0 = arith.muli %arg0, %c3_i32 : i32
    %1 = arith.addi %0, %arg2 : i32
    %c0 = arith.constant 0 : index
    %c0_0 = arith.constant 0 : index
    %c0_1 = arith.constant 0 : index
    %2 = vector.load %arg3[%c0, %c0_0, %c0_1] : memref<1x16x32xf32, #tpu.memory_space<vmem>>, vector<1x16x32xf32>
    %3 = vector.shape_cast %2 : vector<1x16x32xf32> to vector<16x32xf32>
    %4 = arith.mulf %3, %3 : vector<16x32xf32>
    %cst = arith.constant dense<0.000000e+00> : vector<16xf32>
    %5 = vector.multi_reduction <add>, %4, %cst [1] : vector<16x32xf32> to vector<16xf32>
    %6 = vector.shape_cast %5 : vector<16xf32> to vector<16x1xf32>
    %cst_2 = arith.constant 1.000000e-24 : f32
    %7 = vector.broadcast %cst_2 : f32 to vector<16x1xf32>
    %8 = arith.maximumf %6, %7 : vector<16x1xf32>
    %9 = math.rsqrt %8 : vector<16x1xf32>
    %c0_3 = arith.constant 0 : index
    %c0_4 = arith.constant 0 : index
    %10 = vector.load %arg4[%c0_3, %c0_4] : memref<128x32xf32, #tpu.memory_space<vmem>>, vector<128x32xf32>
    %cst_5 = arith.constant dense<0.000000e+00> : vector<16x128xf32>
    %11 = tpu.matmul %3, %10, %cst_5 {dimension_numbers = #tpu.dot_dimension_numbers<[1], [1], [0], [0], [0, 0, 1, 0], [], []>} : vector<16x32xf32>, vector<128x32xf32>, vector<16x128xf32> -> vector<16x128xf32>
    %12 = vector.broadcast %9 : vector<16x1xf32> to vector<16x128xf32>
    %13 = arith.mulf %11, %12 : vector<16x128xf32>
    %c0_6 = arith.constant 0 : index
    %c0_7 = arith.constant 0 : index
    %c0_8 = arith.constant 0 : index
    %14 = vector.load %arg5[%c0_6, %c0_7, %c0_8] : memref<1x16x128xf32, #tpu.memory_space<vmem>>, vector<1x16x128xf32>
    %15 = vector.shape_cast %14 : vector<1x16x128xf32> to vector<16x128xf32>
    %16 = vector.shape_cast %13 : vector<16x128xf32> to vector<1x16x128xf32>
    tpu.vector_store %arg5[%c0_6, %c0_7, %c0_8], %16 {strides = array<i32>} : memref<1x16x128xf32, #tpu.memory_space<vmem>>, vector<1x16x128xf32>,
    %c2_i32 = arith.constant 2 : i32
    %17 = arith.cmpi ne, %1, %c2_i32 : i32
    %18 = arith.extui %17 : i1 to i32
    %c0_i32 = arith.constant 0 : i32
    %19 = arith.cmpi ne, %18, %c0_i32 : i32
    scf.if %19 {
      %cst_11 = arith.constant dense<0xFF800000> : vector<128xf32>
      %23 = vector.multi_reduction <maximumf>, %13, %cst_11 [0] : vector<16x128xf32> to vector<128xf32>
      %24 = vector.shape_cast %23 : vector<128xf32> to vector<1x128xf32>
      %25 = vector.shape_cast %24 : vector<1x128xf32> to vector<1x1x1x128xf32>
      %c0_i32_12 = arith.constant 0 : i32
      %26 = arith.cmpi eq, %arg2, %c0_i32_12 : i32
      %27 = arith.extui %26 : i1 to i32
      %c0_i32_13 = arith.constant 0 : i32
      %28 = arith.cmpi ne, %27, %c0_i32_13 : i32
      scf.if %28 {
        %c0_16 = arith.constant 0 : index
        %c0_17 = arith.constant 0 : index
        %c0_18 = arith.constant 0 : index
        %c0_19 = arith.constant 0 : index
        %32 = vector.load %arg6[%c0_16, %c0_17, %c0_18, %c0_19] : memref<1x1x1x128xf32, #tpu.memory_space<vmem>>, vector<1x1x1x128xf32>
        tpu.vector_store %arg6[%c0_16, %c0_17, %c0_18, %c0_19], %25 {strides = array<i32>} : memref<1x1x1x128xf32, #tpu.memory_space<vmem>>, vector<1x1x1x128xf32>,
      } else {
      }
      %c0_i32_14 = arith.constant 0 : i32
      %29 = arith.cmpi sgt, %arg2, %c0_i32_14 : i32
      %30 = arith.extui %29 : i1 to i32
      %c0_i32_15 = arith.constant 0 : i32
      %31 = arith.cmpi ne, %30, %c0_i32_15 : i32
      scf.if %31 {
        %c0_16 = arith.constant 0 : index
        %c0_17 = arith.constant 0 : index
        %c0_18 = arith.constant 0 : index
        %c0_19 = arith.constant 0 : index
        %32 = vector.load %arg6[%c0_16, %c0_17, %c0_18, %c0_19] : memref<1x1x1x128xf32, #tpu.memory_space<vmem>>, vector<1x1x1x128xf32>
        %33 = arith.maximumf %32, %25 : vector<1x1x1x128xf32>
        %c0_20 = arith.constant 0 : index
        %c0_21 = arith.constant 0 : index
        %c0_22 = arith.constant 0 : index
        %c0_23 = arith.constant 0 : index
        %34 = vector.load %arg6[%c0_20, %c0_21, %c0_22, %c0_23] : memref<1x1x1x128xf32, #tpu.memory_space<vmem>>, vector<1x1x1x128xf32>
        tpu.vector_store %arg6[%c0_20, %c0_21, %c0_22, %c0_23], %33 {strides = array<i32>} : memref<1x1x1x128xf32, #tpu.memory_space<vmem>>, vector<1x1x1x128xf32>,
      } else {
      }
    } else {
    }
    %c2_i32_9 = arith.constant 2 : i32
    %20 = arith.cmpi eq, %1, %c2_i32_9 : i32
    %21 = arith.extui %20 : i1 to i32
    %c0_i32_10 = arith.constant 0 : i32
    %22 = arith.cmpi ne, %21, %c0_i32_10 : i32
    scf.if %22 {
      %23 = tpu.iota {dimensions = array<i32: 0>} : vector<16x1xi32>
      %c4_i32 = arith.constant 4 : i32
      %24 = vector.broadcast %c4_i32 : i32 to vector<16x1xi32>
      %25 = arith.cmpi slt, %23, %24 : vector<16x1xi32>
      %cst_11 = arith.constant 0xFF800000 : f32
      %26 = vector.shape_cast %25 : vector<16x1xi1> to vector<16x1xi1>
      %27 = vector.broadcast %26 : vector<16x1xi1> to vector<16x128xi1>
      %28 = vector.broadcast %cst_11 : f32 to vector<16x128xf32>
      %29 = arith.select %27, %13, %28 : vector<16x128xi1>, vector<16x128xf32>
      %cst_12 = arith.constant dense<0xFF800000> : vector<128xf32>
      %30 = vector.multi_reduction <maximumf>, %29, %cst_12 [0] : vector<16x128xf32> to vector<128xf32>
      %31 = vector.shape_cast %30 : vector<128xf32> to vector<1x128xf32>
      %32 = vector.shape_cast %31 : vector<1x128xf32> to vector<1x1x1x128xf32>
      %c0_i32_13 = arith.constant 0 : i32
      %33 = arith.cmpi eq, %arg2, %c0_i32_13 : i32
      %34 = arith.extui %33 : i1 to i32
      %c0_i32_14 = arith.constant 0 : i32
      %35 = arith.cmpi ne, %34, %c0_i32_14 : i32
      scf.if %35 {
        %c0_17 = arith.constant 0 : index
        %c0_18 = arith.constant 0 : index
        %c0_19 = arith.constant 0 : index
        %c0_20 = arith.constant 0 : index
        %39 = vector.load %arg6[%c0_17, %c0_18, %c0_19, %c0_20] : memref<1x1x1x128xf32, #tpu.memory_space<vmem>>, vector<1x1x1x128xf32>
        tpu.vector_store %arg6[%c0_17, %c0_18, %c0_19, %c0_20], %32 {strides = array<i32>} : memref<1x1x1x128xf32, #tpu.memory_space<vmem>>, vector<1x1x1x128xf32>,
      } else {
      }
      %c0_i32_15 = arith.constant 0 : i32
      %36 = arith.cmpi sgt, %arg2, %c0_i32_15 : i32
      %37 = arith.extui %36 : i1 to i32
      %c0_i32_16 = arith.constant 0 : i32
      %38 = arith.cmpi ne, %37, %c0_i32_16 : i32
      scf.if %38 {
        %c0_17 = arith.constant 0 : index
        %c0_18 = arith.constant 0 : index
        %c0_19 = arith.constant 0 : index
        %c0_20 = arith.constant 0 : index
        %39 = vector.load %arg6[%c0_17, %c0_18, %c0_19, %c0_20] : memref<1x1x1x128xf32, #tpu.memory_space<vmem>>, vector<1x1x1x128xf32>
        %40 = arith.maximumf %39, %32 : vector<1x1x1x128xf32>
        %c0_21 = arith.constant 0 : index
        %c0_22 = arith.constant 0 : index
        %c0_23 = arith.constant 0 : index
        %c0_24 = arith.constant 0 : index
        %41 = vector.load %arg6[%c0_21, %c0_22, %c0_23, %c0_24] : memref<1x1x1x128xf32, #tpu.memory_space<vmem>>, vector<1x1x1x128xf32>
        tpu.vector_store %arg6[%c0_21, %c0_22, %c0_23, %c0_24], %40 {strides = array<i32>} : memref<1x1x1x128xf32, #tpu.memory_space<vmem>>, vector<1x1x1x128xf32>,
      } else {
      }
    } else {
    }
    return
  }
  func.func @transform_0(%arg0: i32, %arg1: i32, %arg2: i32) -> (i32, i32, i32) {
    %c3_i32 = arith.constant 3 : i32
    %0 = arith.muli %arg0, %c3_i32 : i32
    %1 = arith.addi %0, %arg2 : i32
    %c0_i32 = arith.constant 0 : i32
    %c0_i32_0 = arith.constant 0 : i32
    return %arg1, %1, %c0_i32 : i32, i32, i32
  }
  func.func @transform_1(%arg0: i32, %arg1: i32, %arg2: i32) -> (i32, i32) {
    %c0_i32 = arith.constant 0 : i32
    %c0_i32_0 = arith.constant 0 : i32
    %c0_i32_1 = arith.constant 0 : i32
    return %c0_i32, %c0_i32_0 : i32, i32
  }
  func.func @transform_2(%arg0: i32, %arg1: i32, %arg2: i32) -> (i32, i32, i32) {
    %c3_i32 = arith.constant 3 : i32
    %0 = arith.muli %arg0, %c3_i32 : i32
    %1 = arith.addi %0, %arg2 : i32
    %c0_i32 = arith.constant 0 : i32
    %c0_i32_0 = arith.constant 0 : i32
    return %arg1, %1, %c0_i32 : i32, i32, i32
  }
  func.func @transform_3(%arg0: i32, %arg1: i32, %arg2: i32) -> (i32, i32, i32, i32) {
    %c0_i32 = arith.constant 0 : i32
    %c0_i32_0 = arith.constant 0 : i32
    %c0_i32_1 = arith.constant 0 : i32
    return %arg0, %arg1, %c0_i32, %c0_i32_0 : i32, i32, i32, i32
  }
}

</mosaic_0001>

<bundles_post_ra>
// kernel: tpu_custom_call.1
= control target key start
LH: loop header
LB: loop body
LE: loop exit
PB: predicated region body
PF: predicated region fallthrough
CT: control target
= control target key end

     0   :  { %9 = vsyncpa [#allocation4], 0  ;;  %s1587_s0 = inlined_call_operand.vmem [shape: f32[2,36,32], index: 0, kind: input, shape index: {}]   ;;  %s1588_s1 = inlined_call_operand.vmem [shape: f32[128,32], index: 1, kind: input, shape index: {}]   ;;  %s1589_s2 = inlined_call_operand.vmem [shape: f32[2,36,128], index: 2, kind: output, shape index: {0}]   ;;  %s1590_s3 = inlined_call_operand.hbm [shape: f32[1,2,1,128], index: 3, kind: output, shape index: {1}]  }
   0x1   :  { %11 = vsyncpa [#allocation4 + $0x1], 0  ;;  %s1286_s12 = smov 0   ;;  %s1288_s13 = smov 0  }
   0x2   :  { %s1290_s14 = smov 0   ;;  %s1292_s15 = smov 0  }
   0x3   :  { %s1294_s16 = smov 0   ;;  %s1296_s17 = smov 0  }
   0x4   :  { %s1298_s18 = smov 0   ;;  %s1300_s19 = smov 0  }
   0x5   :  { %s1302_s20 = smov 0   ;;  %s1304_s21 = smov 0  }
   0x6 LB: > { %1594 = sst [smem:[#allocation6_spill]] %s1227_s20  ;;  %s779_s22 = sadd.s32 4294967295, %s1231_s21   ;;  %s1231_s21 = sphi %s1304_s21, %s17_s21   ;;  %s1227_s20 = sphi %s1302_s20, %s1606_s20   ;;  %s1223_s19 = sphi %s1300_s19, %s1613_s19   ;;  %s1219_s18 = sphi %s1298_s18, %s1604_s18   ;;  %s1215_s17 = sphi %s1296_s17, %s1612_s17   ;;  %s1211_s16 = sphi %s1294_s16, %s1611_s16   ;;  %s1207_s15 = sphi %s1292_s15, %s1610_s15   ;;  %s1203_s14 = sphi %s1290_s14, %s1609_s14   ;;  %s1199_s13 = sphi %s1288_s13, %s1608_s13   ;;  %s1195_s12 = sphi %s1286_s12, %s1607_s12  }
   0x7   : > { %s780_s23 = sadd.s32 4294967294, %s1231_s21   ;;  %s29_s24 = sadd.s32 1, %s1223_s19 }
   0x8   : > { %s32_s25 = sadd.s32 1, %s1227_s20  ;;  %p30_p0 = scmp.ge.s32.totalorder %s29_s24, 3 }
   0x9   : > { %s102_s26 = sadd.s32 1, %s1211_s16  ;;  %p112_p1 = scmp.ne.s32.totalorder %s1211_s16, %s1207_s15 }
   0xa   : > { %p113_p2 = scmp.eq.s32.totalorder %s779_s22, 5  ;;  %s1615_s24 = smov (%p30_p0, %s29_s24), 0 }
   0xb   : > { %1595 = sst [smem:[#allocation7_spill]] %s1615_s24  ;;  %s1617_s25 = smov (!%p30_p0, %s32_s25), %s1227_s20 }
   0xc   : > { %s98_s27 = ssub.s32 %s1223_s19, %s1615_s24  ;;  %p1348_p3 = por %p113_p2, %p112_p1 }
   0xd   : > { %p34_p4 = scmp.ge.s32.totalorder %s1617_s25, 2  ;;  %s130_s29 = sadd.s32 1, %s1203_s14 }
   0xe   : > { %p140_p5 = scmp.ne.s32.totalorder %s1203_s14, %s1199_s13  ;;  %p146_p6 = scmp.ne.s32.totalorder %s1199_s13, %s1195_s12 }
   0xf   : > { %s1619_s25 = smov (%p34_p4, %s1617_s25), 0  ;;  %p147_p8 = scmp.eq.s32.totalorder %s780_s23, 5 }
  0x10   : > { %1597 = sst [smem:[#allocation8_spill]] %s1619_s25  ;;  %p1359_p7 = por %p140_p5, %p113_p2 }
  0x11   : > { %s97_s4 = ssub.s32 %s1227_s20, %s1619_s25  ;;  %p783_p9 = scmp.ge.s32.totalorder %s1231_s21, 1 }
  0x12   : > { %s99_s5 = sor.u32 %s98_s27, %s97_s4  ;;  %p128_p10 = scmp.eq.s32.totalorder %s97_s4, 0 }
  0x13   : > { %p100_p11 = scmp.eq.s32.totalorder %s99_s5, 0  ;;  %p1366_p12 = por %p147_p8, %p146_p6 }
  0x14   : > { %s1371_s7 = scalar_select %p128_p10, %s1203_s14, %s130_s29  }
  0x15   : > { %s1374_s8 = scalar_select %p100_p11, %s1211_s16, %s102_s26  }
  0x16   : > { %p193_p13 = scmp.lt.s32.totalorder %s1231_s21, 7 }
  0x18   : > { %p194_p0 = pnand %p783_p9, %p193_p13 }
  0x19   : > { %vm265_vm0 = vcmask (!%p194_p0), 261120   ;;  %v276_v0 = vld [vmem:[%s1588_s1] sm:$0xff] (!%p194_p0)  ;;  %v277_v1 = vld [vmem:[%s1588_s1 + $0x8] sm:$0xff] (!%p194_p0)  ;;  %v278_v2 = vld [vmem:[%s1588_s1 + $0x10] sm:$0xff] (!%p194_p0)  ;;  %s1388_s29 = sshll.u32 (!%p194_p0), %s1215_s17, 1  ;;  %p237_p1 = scmp.lt.s32.totalorder (!%p194_p0), %s1219_s18, 1 }
  0x1a   : > { %197 = sbr.rel (%p194_p0) target bundleno = 442 (0x1ba), region = 28  ;;  %v884_v3 = vpack.c.bf16 (!%p194_p0), %v277_v1, %v276_v0  ;;  %vm1392_vm1 = vmpackc.low (!%p194_p0), %vm265_vm0, %vm265_vm0  ;;  %v279_v5 = vld [vmem:[%s1588_s1 + $0x18] sm:$0xff] (!%p194_p0)  ;;  %p239_p2 = scmp.lt.s32.totalorder (!%p194_p0), %s1388_s29, 4  ;;  %v280_v7 = vld [vmem:[%s1588_s1 + $0x20] sm:$0xff] (!%p194_p0) }
  0x1b   : > { %v890_v6 = vpack.c.bf16 (!%p194_p0), %v279_v5, %v278_v2  ;;  %v281_v8 = vld [vmem:[%s1588_s1 + $0x28] sm:$0xff] (!%p194_p0)  ;;  %v282_v15 = vld [vmem:[%s1588_s1 + $0x30] sm:$0xff] (!%p194_p0)  ;;  %v283_v16 = vld [vmem:[%s1588_s1 + $0x38] sm:$0xff] (!%p194_p0)  ;;  %s221_s27 = sand.u32 (!%p194_p0), 1, %s1207_s15   ;;  %p805_p4 = scmp.eq.s32.totalorder (!%p194_p0), %s1215_s17, 2 }
  0x1c   : > { %886 = vmatprep.subr.msk.bf16.mxu0 (!%p194_p0), %vm1392_vm1, %v884_v3  ;;  %v896_v9 = vpack.c.bf16 (!%p194_p0), %v281_v8, %v280_v7  ;;  %v902_v18 = vpack.c.bf16 (!%p194_p0), %v283_v16, %v282_v15  ;;  %v284_v19 = vld [vmem:[%s1588_s1 + $0x40] sm:$0xff] (!%p194_p0)  ;;  %v285_v20 = vld [vmem:[%s1588_s1 + $0x48] sm:$0xff] (!%p194_p0)  ;;  %v286_v22 = vld [vmem:[%s1588_s1 + $0x50] sm:$0xff] (!%p194_p0)  ;;  %s784_s26 = sshll.u32 (!%p194_p0), %s221_s27, 4 }
  0x1d   : > { %889 = vmatpush3.bf16.xpose.msk.msra.mxu0 (!%p194_p0), %vm1392_vm1, %v884_v3  ;;  %v908_v21 = vpack.c.bf16 (!%p194_p0), %v285_v20, %v284_v19  ;;  %v287_v23 = vld [vmem:[%s1588_s1 + $0x58] sm:$0xff] (!%p194_p0)  ;;  %v288_v25 = vld [vmem:[%s1588_s1 + $0x60] sm:$0xff] (!%p194_p0)  ;;  %v289_v26 = vld [vmem:[%s1588_s1 + $0x68] sm:$0xff] (!%p194_p0)  ;;  %s1479_s4 = scalar_lea.vmem (!%p194_p0), [#allocation2], %s784_s26  }
  0x1e   : > { %892 = vmatprep.subr.msk.bf16.mxu0 (!%p194_p0), %vm1392_vm1, %v890_v6  ;;  %v914_v24 = vpack.c.bf16 (!%p194_p0), %v287_v23, %v286_v22  ;;  %v920_v27 = vpack.c.bf16 (!%p194_p0), %v289_v26, %v288_v25  ;;  %v290_v28 = vld [vmem:[%s1588_s1 + $0x70] sm:$0xff] (!%p194_p0)  ;;  %v291_v29 = vld [vmem:[%s1588_s1 + $0x78] sm:$0xff] (!%p194_p0) }
  0x1f   : > { %v926_v30 = vpack.c.bf16 (!%p194_p0), %v291_v29, %v290_v28 }
  0x21   : > { %s238_s10 = scalar_select %p237_p1, %s1219_s18, 1 }
  0x22   : > { %s240_s11 = scalar_select %p239_p2, %s1388_s29, 4 }
  0x23   : > { %s932_s22 = smul.u32 5, %s238_s10  ;;  %p806_p5 = scmp.ne.s32.totalorder (!%p805_p4), %s1215_s17, 0 }
  0x25   : > { %s242_s5 = sadd.s32 %s932_s22, %s240_s11  ;;  %895 = vmatpush3.bf16.xpose.msk.msra.mxu0 %vm1392_vm1, %v890_v6 }
  0x26   : > { %s786_s9 = sshll.u32 %s242_s5, 3  ;;  %898 = vmatprep.subr.msk.bf16.mxu0 %vm1392_vm1, %v896_v9  ;;  %s1602_s5 = sand.u32 1, %s1199_s13  }
  0x27   : > { %s244_s20 = scalar_lea.vmem %s1587_s0, %s786_s9  ;;  %s1485_s10 = scalar_lea.vmem [#allocation3], %s1602_s5 }
  0x28   : > { %v261_v10 = vld [vmem:[%s244_s20] sm:$0xff]  ;;  %v262_v11 = vld [vmem:[%s244_s20 + $0x8] sm:$0xff] }
  0x29   : > { %v263_v12 = vmul.f32 %v261_v10, %v261_v10  ;;  %881 = vmatprep.mubr.msk.f32.mxu0 %vm265_vm0, %v261_v10  ;;  %v264_v13 = vmul.f32 %v262_v11, %v262_v11 }
  0x2b   : > { %v266_v14 = vsel %vm265_vm0, %v263_v12, 0.0  ;;  %v269_v17 = vsel %vm265_vm0, %v264_v13, 0.0 }
  0x2c   : > { %267 = vadd.xlane.f32.xlu0 %v266_v14 }
  0x2d   : > { %901 = vmatpush3.bf16.xpose.msk.msra.mxu0 %vm1392_vm1, %v896_v9 }
  0x2e   : > { %904 = vmatprep.subr.msk.bf16.mxu0 %vm1392_vm1, %v902_v18 }
  0x30   : > { %270 = vadd.xlane.f32.xlu0 %v269_v17 }
  0x35   : > { %907 = vmatpush3.bf16.xpose.msk.msra.mxu0 %vm1392_vm1, %v902_v18 }
  0x36   : > { %910 = vmatprep.subr.msk.bf16.mxu0 %vm1392_vm1, %v908_v21 }
  0x3d   : > { %913 = vmatpush3.bf16.xpose.msk.msra.mxu0 %vm1392_vm1, %v908_v21 }
  0x3e   : > { %916 = vmatprep.subr.msk.bf16.mxu0 %vm1392_vm1, %v914_v24 }
  0x45   : > { %919 = vmatpush3.bf16.xpose.msk.msra.mxu0 %vm1392_vm1, %v914_v24 }
  0x46   : > { %922 = vmatprep.subr.msk.bf16.mxu0 %vm1392_vm1, %v920_v27 }
  0x4d   : > { %925 = vmatpush3.bf16.xpose.msk.msra.mxu0 %vm1392_vm1, %v920_v27 }
  0x4e   : > { %928 = vmatprep.subr.msk.bf16.mxu0 %vm1392_vm1, %v926_v30 }
  0x55   : > { %931 = vmatpush3.bf16.xpose.msk.msra.mxu0 %vm1392_vm1, %v926_v30 }
  0x5c   : > { %882 = vmatmul.mubr.msk.f32.vlgmr.msra.gmra.mrb[0].mxu0 %vm265_vm0, %v262_v11 }
  0xb9   : > { %v268_v31 = vpop.xlane.xlu0 %267 }
  0xba   : > { %v272_v34 = vmax.f32 %v268_v31, 1e-24 }
  0xbd   : > { %v271_v32 = vpop.xlane.xlu0 %270 }
  0xbe   : > { %v273_v33 = vmax.f32 %v271_v32, 1e-24 }
  0xc0   : > { %1085 = vrsqrt.f32 %v273_v33 }
  0xc1   : > { %1087 = vrsqrt.f32 %v272_v34 }
  0xca   : > { %v1086_v35 = vpop.eup %1085 }
  0xcb   : > { %v1088_v37 = vpop.eup %1087 }
 0x12d   : > { %428 = sbr.rel (%p805_p4) target bundleno = 332 (0x14c), region = 32 }
 0x12f   : > { %v883_v36 = vpop.f32.mrb[0].mxu0 }
 0x130   : > { %v422_v38 = vmul.f32 %v1086_v35, %v883_v36  ;;  %v412_v39 = vpop.f32.mrb[1].mxu0 }
 0x131   : > { %v421_v40 = vmul.f32 %v1088_v37, %v412_v39 }
 0x132   : > { %424 = vst [vmem:[%s1479_s4 + $0x8] sm:$0xff] %v422_v38 }
 0x133   : > { %423 = vst [vmem:[%s1479_s4] sm:$0xff] %v421_v40  ;;  %v429_v41 = vmax.f32 (!%p805_p4), %v421_v40, %v422_v38 }
 0x135   : > { %v430_v42 = vrot.slane %v429_v41, 4 }
 0x137   : > { %v431_v43 = vmax.f32 %v429_v41, %v430_v42 }
 0x139   : > { %v432_v44 = vrot.slane %v431_v43, 2  ;;  %439 = sbr.rel (%p806_p5) target bundleno = 322 (0x142), region = 36 }
 0x13b   : > { %v433_v45 = vmax.f32 %v431_v43, %v432_v44 }
 0x13d   : > { %v434_v46 = vrot.slane %v433_v45, 1 }
 0x13f   : > { %v435_v47 = vmax.f32 %v433_v45, %v434_v46 }
 0x141   : > { %440 = vst [vmem:[%s1485_s10] sm:$0x1] %v435_v47 }
 0x142 PF: > { %p807_p6 = scmp.le.s32.totalorder %s1215_s17, 0 }
 0x144   : > { %444 = sbr.rel (%p807_p6) target bundleno = 332 (0x14c), region = 40 }
 0x148   : > { %v445_v48 = vld [vmem:[%s1485_s10] sm:$0x1] (!%p807_p6) }
 0x149   : > { %v446_v49 = vmax.f32 (!%p807_p6), %v445_v48, %v435_v47 }
 0x14b   : > { %447 = vst [vmem:[%s1485_s10] sm:$0x1] %v446_v49 }
 0x14c PF: > { %p808_p8 = scmp.ne.s32.totalorder %s1215_s17, 2 }
 0x14d   : > { %v452_v50 = vlaneseq (!%p808_p8)  ;;  %p809_p9 = scmp.ne.s32.totalorder (!%p808_p8), %s1215_s17, 0 }
 0x14e   : > { %451 = sbr.rel (%p808_p8) target bundleno = 362 (0x16a), region = 44 }
 0x14f   : > { %v453_v51 = vshrl.u32 (!%p808_p8), %v452_v50, 7 }
 0x151   : > { %vm455_vm2 = vcmp.lt.s32.totalorder (!%p808_p8), %v453_v51, 4 }
 0x152   : > { %v461_v52 = vsel (!%p808_p8), %vm455_vm2, %v421_v40, -inf }
 0x153   : > { %v464_v53 = vrot.slane (!%p808_p8), %v461_v52, 4 }
 0x155   : > { %v465_v54 = vmax.f32 %v461_v52, %v464_v53 }
 0x157   : > { %v466_v55 = vrot.slane %v465_v54, 2  ;;  %473 = sbr.rel (%p809_p9) target bundleno = 352 (0x160), region = 48 }
 0x159   : > { %v467_v56 = vmax.f32 %v465_v54, %v466_v55 }
 0x15b   : > { %v468_v57 = vrot.slane %v467_v56, 1 }
 0x15d   : > { %v469_v58 = vmax.f32 %v467_v56, %v468_v57 }
 0x15f   : > { %474 = vst [vmem:[%s1485_s10] sm:$0x1] %v469_v58 }
 0x160 PF: > { %p810_p10 = scmp.le.s32.totalorder %s1215_s17, 0 }
 0x162   : > { %478 = sbr.rel (%p810_p10) target bundleno = 362 (0x16a), region = 52 }
 0x166   : > { %v479_v59 = vld [vmem:[%s1485_s10] sm:$0x1] (!%p810_p10) }
 0x167   : > { %v480_v60 = vmax.f32 (!%p810_p10), %v479_v59, %v469_v58 }
 0x169   : > { %481 = vst [vmem:[%s1485_s10] sm:$0x1] %v480_v60 }
 0x16a PF: > { %s1603_s15 = sand.u32 1, %s1199_s13   ;;  %492 = sbr.rel (!%p1348_p3) target bundleno = 418 (0x1a2), region = 56 }
 0x16b   : > { %s1501_s11 = scalar_lea.sflag [#allocation4], %s1603_s15  ;;  %s496_s24 = ssub.s32 (%p1348_p3), 5, %s1388_s29 }
 0x16c   : > { %s933_s17 = smul.u32 (%p1348_p3), 5, %s1219_s18  ;;  %p497_p11 = scmp.lt.s32.totalorder (%p1348_p3), %s496_s24, 2 }
 0x16e   : > { %s502_s25 = sadd.s32 (%p1348_p3), %s933_s17, %s1388_s29 }
 0x16f   : > { %s815_s20 = sshll.u32 (%p1348_p3), %s502_s25, 3 }
 0x170   : > { %s1514_s27 = scalar_lea.vmem (%p1348_p3), %s1589_s2, %s815_s20  }
 0x171   : > { %s1621_s24 = smov (!%p497_p11, %s496_s24), 2 }
 0x172   : > { %s813_s9 = sshll.u32 %s1621_s24, 7 }
 0x173   : > { %p816_p13 = scmp.eq.s32.totalorder %s813_s9, 0 }
 0x174   : > { %s1517_s28 = sshrl.u32 (!%p816_p13), %s1621_s24, 1 }
 0x175   : > { %507 = sbr.rel (%p816_p13) target bundleno = 418 (0x1a2), region = 60  ;;  %p817_p3 = scmp.le.s32.totalorder (!%p816_p13), %s1517_s28, 0 }
 0x17c   : > { %712 = sbr.rel (%p817_p3) target bundleno = 397 (0x18d), region = 153  ;;  %s1233_s29 = smov (!%p817_p3), %s1514_s27  }
 0x17d   : > { %s1237_s26 = smov (!%p817_p3), %s1479_s4   ;;  %s1241_s5 = smov (!%p817_p3), 0  }
 0x17e   : > { %s1245_s15 = smov (!%p817_p3), 0  }
 0x183 LB: >> { %v571_v61 = vld [vmem:[%s1239_s26] sm:$0xff]  ;;  %v573_v62 = vld [vmem:[%s1239_s26 + $0x8] sm:$0xff]  ;;  %s575_s17 = sadd.s32 1, %s1243_s5  ;;  %s565_s15 = sadd.s32 1, %s1247_s15   ;;  %s1247_s15 = sphi %s1245_s15, %s565_s15   ;;  %s1243_s5 = sphi %s1241_s5, %s1242_s5   ;;  %s1239_s26 = sphi %s1237_s26, %s580_s26   ;;  %s1235_s29 = sphi %s1233_s29, %s581_s29  }
 0x184   : >> { %572 = vst [vmem:[%s1235_s29] sm:$0xff] %v571_v61  ;;  %574 = vst [vmem:[%s1235_s29 + $0x8] sm:$0xff] %v573_v62  ;;  %p576_p0 = scmp.ge.s32.totalorder %s575_s17, %s1517_s28  ;;  %p564_p1 = scmp.ge.s32.totalorder %s565_s15, %s1517_s28 }
 0x186   : >> { %s1623_s17 = smov (%p576_p0, %s575_s17), 0  ;;  %567 = sbr.rel (!%p564_p1) target bundleno = 387 (0x183), region = 159 }
 0x187   : >> { %s818_s25 = sshll.u32 %s1623_s17, 4  ;;  %s1242_s5 = smov %s1623_s17  }
 0x188   : >> { %s580_s26 = scalar_lea.vmem %s1479_s4, %s818_s25 [#allocation2]   ;;  %s581_s29 = scalar_lea.vmem %s1514_s27, %s818_s25  }
 0x18d PF: > { %s1527_s20 = sand.u32 1, %s1621_s24   ;;  %s829_s9 = sshll.u32 %s1517_s28, 4 }
 0x18e   : > { %s586_s22 = scalar_lea.vmem %s1479_s4, %s829_s9 [#allocation2]   ;;  %s588_s23 = scalar_lea.vmem %s1514_s27, %s829_s9  }
 0x18f   : > { %p823_p2 = scmp.le.s32.totalorder %s1527_s20, 0 }
 0x190   : > { %s1249_s5 = smov (!%p823_p2), %s588_s23   ;;  %s1253_s25 = smov (!%p823_p2), %s586_s22  }
 0x191   : > { %726 = sbr.rel (%p823_p2) target bundleno = 418 (0x1a2), region = 164  ;;  %s1257_s29 = smov (!%p823_p2), 0  }
 0x192   : > { %s1261_s26 = smov (!%p823_p2), 0  }
 0x198 LB: >> { %v598_v63 = vld [vmem:[%s1255_s25] sm:$0xff]  ;;  %s600_s24 = sadd.s32 1, %s1259_s29  ;;  %s592_s26 = sadd.s32 1, %s1263_s26   ;;  %s1263_s26 = sphi %s1261_s26, %s592_s26   ;;  %s1259_s29 = sphi %s1257_s29, %s1258_s29   ;;  %s1255_s25 = sphi %s1253_s25, %s605_s25   ;;  %s1251_s5 = sphi %s1249_s5, %s606_s5  }
 0x199   : >> { %599 = vst [vmem:[%s1251_s5] sm:$0xff] %v598_v63  ;;  %p601_p4 = scmp.ge.s32.totalorder %s600_s24, %s1527_s20  ;;  %p591_p5 = scmp.ge.s32.totalorder %s592_s26, %s1527_s20 }
 0x19b   : >> { %s1625_s24 = smov (%p601_p4, %s600_s24), 0  ;;  %594 = sbr.rel (!%p591_p5) target bundleno = 408 (0x198), region = 170 }
 0x19c   : >> { %s824_s4 = sshll.u32 %s1625_s24, 3  ;;  %s1258_s29 = smov %s1625_s24  }
 0x19d   : >> { %s605_s25 = scalar_lea.vmem %s586_s22, %s824_s4 [#allocation2]   ;;  %s606_s5 = scalar_lea.vmem %s588_s23, %s824_s4  }
 0x1a2 PF: > { %s826_s27 = sshll.u32 %s1219_s18, 4  ;;  %s621_s28 = sshll.u32 %s1485_s10, 4  ;;  %s622_s28 = int_to_ptr.vmem [resolvable:$true] %s621_s28 }
 0x1a3   : > { %s619_s9 = scalar_lea.hbm %s1590_s3, %s826_s27  ;;  %s1089_s29 = scalar_lea.vmem %s622_s28, 16 }
 0x1a4   : > { %p1090_p6 = scmp.ne.s32.totalorder %s622_s28, %s1089_s29  ;;  %s1265_s5 = smov [#allocation3]  }
 0x1a5   : > { %s1093_s25 = sshll.u32 %s1265_s5, 4  ;;  %s1094_s25 = int_to_ptr.vmem [resolvable:$false] %s1093_s25 }
 0x1a6   : > { %p1091_p8 = pnand %p1090_p6, %p1359_p7  ;;  %s1095_s20 = scalar_lea.vmem %s1094_s25, 32 }
 0x1a7   : > { %p1096_p10 = scmp.lt.s32.totalorder %s622_s28, %s1094_s25  ;;  %p1097_p11 = scmp.lt.s32.totalorder %s1095_s20, %s1089_s29 }
 0x1a8   : > { %p1092_p9 = pneg %p1091_p8 }
 0x1a9   : > { %p1098_p13 = por %p1097_p11, %p1096_p10 }
 0x1ab   : > { %p1099_p3 = pnand %p1098_p13, %p1092_p9 }
 0x1ad   : > { %1102 = shalt.err (!%p1099_p3)
}
 0x1ae   : > { %s1103_s18 = scalar_lea.hbm %s619_s9, 16  ;;  %s1107_s23 = scalar_lea.hbm %s1590_s3, 32 }
 0x1af   : > { %p1104_p0 = scmp.ne.s32.totalorder %s619_s9, %s1103_s18  ;;  %p1108_p4 = scmp.lt.u32.totalorder %s619_s9, %s1590_s3 }
 0x1b0   : > { %p1109_p5 = scmp.lt.u32.totalorder %s1107_s23, %s1103_s18  ;;  %p1111_p8 = scmp.lt.u32.totalorder %s1103_s18, %s619_s9 }
 0x1b1   : > { %p1105_p1 = pnand %p1104_p0, %p1359_p7 }
 0x1b2   : > { %p1110_p6 = por %p1109_p5, %p1108_p4 }
 0x1b3   : > { %p1106_p2 = pneg %p1105_p1 }
 0x1b4   : > { %p1112_p10 = por %p1111_p8, %p1110_p6 }
 0x1b6   : > { %p1113_p9 = pnand %p1112_p10, %p1106_p2 }
 0x1b8   : > { %1116 = shalt.err (!%p1113_p9)
}
 0x1b9   : > { %934 = dma.vmem_to_hbm [thread:$0]  (%p1359_p7), %s622_s28, 16, %s619_s9, %s1501_s11  }
 0x1ba PF: > { %p940_p11 = scmp.ge.s32.totalorder %s1231_s21, 2  ;;  %s640_s4 = sand.u32 1, %s1195_s12  }
 0x1bb   : > { %s641_s27 = scalar_lea.sflag [#allocation4], %s640_s4 }
 0x1bc   : > { %p937_p13 = pnand %p940_p11, %p1366_p12 }
 0x1be   : > { %1190 = dma.done.wait (!%p937_p13), %s641_s27, 16  }
 0x1bf   : > { %1192 = vsyncadd (!%p937_p13), %s641_s27, 4294967280  ;;  %s17_s21 = sadd.s32 1, %s1231_s21   ;;  %s1604_s18 = sld [smem:[#allocation6_spill]] }
 0x1c0   : > { %p14_p3 = scmp.ge.s32.totalorder %s17_s21, 8   ;;  %s1605_s30 = sld [smem:[#allocation7_spill]] }
 0x1c1   : > { %s1606_s20 = sld [smem:[#allocation8_spill]]  ;;  %s1607_s12 = smov %s1199_s13 }
 0x1c2   : > { %s1608_s13 = smov %s1203_s14  ;;  %s1609_s14 = smov %s1371_s7 }
 0x1c3   : > { %s1610_s15 = smov %s1211_s16  ;;  %s1611_s16 = smov %s1374_s8 }
 0x1c4   : > { %s1612_s17 = smov %s1223_s19  ;;  %16 = sbr.rel (!%p14_p3) target bundleno = 6 (0x6), region = 181 }
 0x1c6   : > { %s1613_s19 = smov %s1605_s30 }
 0x1cb   :  { %645 = vsyncpa [#allocation4], 1 }
 0x1cc   :  { %647 = vsyncpa [#allocation4 + $0x1], 1 }

</bundles_post_ra>
